<compile_context>
chip_gen: v6e
topology: v6e:2x2x1
jax: 0.10.0
libtpu: 0.0.40
codegen_flags: <defaults>
</compile_context>

<pallas_src>
import numpy as np
import jax
import jax.numpy as jnp
from jax.experimental import pallas as pl
from jax.experimental.pallas import tpu as pltpu


def _make_conv3x3_relu_kernel(H, W, Cin, Cout, compute_dtype):
    HW = H * W
    P = W + 1  # halo width (in flattened pixels) on each side

    def kernel(x_ref, w_ref, m_ref, o_ref, xpad_ref, rhs_ref):
        # x_ref   : (1, Cin, HW)      f32, one batch element, flattened CHW
        # w_ref   : (Cout, 9*Cin)     compute_dtype, col = (dy*3+dx)*Cin + ci
        # m_ref   : (2, HW)           f32 {0,1}: row0 = "w > 0", row1 = "w < W-1"
        # o_ref   : (1, Cout, HW)     f32, lane-dense output block
        # xpad_ref: (Cin, HW + 2*P)   f32 VMEM scratch (halo-padded flat image)
        # rhs_ref : (9*Cin, HW)       f32 VMEM scratch (stacked shifted taps)

        # Build the halo-padded image in VMEM (no HBM pad, no extra DMA bytes).
        xpad_ref[...] = jnp.zeros_like(xpad_ref)
        xpad_ref[:, P:P + HW] = x_ref[0]

        # Masks that kill the left/right row-wraparound of the flattened layout.
        not_left = m_ref[0:1, :]    # for dx == 0 taps (needs w-1 >= 0)
        not_right = m_ref[1:2, :]   # for dx == 2 taps (needs w+1 <= W-1)

        # Stack the 9 shifted taps along K. Each tap is a static lane-slice of
        # the padded scratch -> no reshapes / relayouts per tap.
        for dy in range(3):
            for dx in range(3):
                t = dy * 3 + dx
                start = P + (dy - 1) * W + (dx - 1)
                shifted = xpad_ref[:, start:start + HW]          # (Cin, HW)
                if dx == 0:
                    shifted = shifted * not_left
                elif dx == 2:
                    shifted = shifted * not_right
                rhs_ref[t * Cin:(t + 1) * Cin, :] = shifted

        # One MXU matmul: (Cout, 9*Cin) @ (9*Cin, HW), f32 accumulation.
        rhs = rhs_ref[...].astype(compute_dtype)
        acc = jnp.dot(w_ref[...], rhs, preferred_element_type=jnp.float32)
        o_ref[0] = jnp.maximum(acc, 0.0).astype(o_ref.dtype)     # ReLU

    return kernel


def conv3x3_relu_nchw(x_nchw, w_oihw, *, compute_dtype=jnp.bfloat16):
    """Forward of `layer`: Conv2d(3x3, padding=1, bias=False) + ReLU.

    x_nchw: (B, Cin, H, W) float32; w_oihw: (Cout, Cin, 3, 3) float32 (OIHW).
    Returns (B, Cout, H, W) float32. compute_dtype controls MXU operand dtype
    (bf16 for v6e/v7x throughput; accumulation is f32 either way).
    """
    B, Cin, H, W = x_nchw.shape
    Cout = w_oihw.shape[0]
    HW = H * W

    # Free row-major views (no transpose, no pad -> no extra HBM traffic).
    x_flat = x_nchw.reshape(B, Cin, HW)

    # (Cout, Cin, 3, 3) -> (Cout, 3, 3, Cin) -> (Cout, 9*Cin); column index
    # (dy*3+dx)*Cin + ci matches the tap stacking order in the kernel.
    w_mat = jnp.transpose(w_oihw, (0, 2, 3, 1)).reshape(Cout, 9 * Cin)
    w_mat = w_mat.astype(compute_dtype)

    # Static edge masks for the flattened pixel axis (built at trace time).
    col = np.arange(HW, dtype=np.int32) % W
    edge_mask = jnp.asarray(np.stack([col > 0, col < W - 1]).astype(np.float32))

    kernel = _make_conv3x3_relu_kernel(H, W, Cin, Cout, compute_dtype)

    out_flat = pl.pallas_call(
        kernel,
        out_shape=jax.ShapeDtypeStruct((B, Cout, HW), x_nchw.dtype),
        grid_spec=pltpu.PrefetchScalarGridSpec(
            num_scalar_prefetch=0,
            grid=(B,),
            in_specs=[
                pl.BlockSpec((1, Cin, HW), lambda b: (b, 0, 0)),
                pl.BlockSpec((Cout, 9 * Cin), lambda b: (0, 0)),
                pl.BlockSpec((2, HW), lambda b: (0, 0)),
            ],
            out_specs=pl.BlockSpec((1, Cout, HW), lambda b: (b, 0, 0)),
            scratch_shapes=[
                pltpu.VMEM((Cin, HW + 2 * (W + 1)), jnp.float32),
                pltpu.VMEM((9 * Cin, HW), jnp.float32),
            ],
        ),
        compiler_params=pltpu.CompilerParams(
            # Batch axis is independent -> both v7x TensorCores get work.
            # TODO(synk): for B == 1 (or odd B) add an H-tile parallel grid axis
            # so the second v7x TensorCore is not idle.
            dimension_semantics=("parallel",)),
    )(x_flat, w_mat, edge_mask)

    return out_flat.reshape(B, Cout, H, W)


def reference_conv3x3_relu(x_nchw, w_oihw):
    """Plain-JAX reference (lax conv) for validation."""
    y = jax.lax.conv_general_dilated(
        x_nchw, w_oihw, window_strides=(1, 1), padding=((1, 1), (1, 1)),
        dimension_numbers=("NCHW", "OIHW", "NCHW"))
    return jnp.maximum(y, 0.0)


if __name__ == "__main__":
    # Small shapes consistent with the module: batch=2, ich=4, och=8, 16x16.
    B, ICH, OCH, H, W = 2, 4, 8, 16, 16

    key = jax.random.PRNGKey(0)
    kx, kw = jax.random.split(key)
    x = jax.random.normal(kx, (B, ICH, H, W), dtype=jnp.float32)
    fan_in = ICH * 3 * 3
    bound = (1.0 / fan_in) ** 0.5
    w = jax.random.uniform(kw, (OCH, ICH, 3, 3), dtype=jnp.float32,
                           minval=-bound, maxval=bound)
    # NOTE: self.bn is declared in __init__ but never used in forward().

    ref = reference_conv3x3_relu(x, w)

    # Exact path (f32 MXU operands) -> tight tolerance validates tap/mask logic.
    out_f32 = jax.block_until_ready(
        conv3x3_relu_nchw(x, w, compute_dtype=jnp.float32))
    assert out_f32.shape == (B, OCH, H, W)
    assert jnp.allclose(out_f32, ref, atol=1e-4, rtol=1e-4), "f32 mismatch"

    # bf16-operand path (v6e/v7x MXU-native), f32 accumulation.
    out_bf16 = jax.block_until_ready(
        conv3x3_relu_nchw(x, w, compute_dtype=jnp.bfloat16))
    assert out_bf16.shape == (B, OCH, H, W)
    assert jnp.allclose(out_bf16, ref, atol=5e-2, rtol=5e-2), "bf16 mismatch"

    print("KERNEL_OK")
</pallas_src>

<mosaic_0001>
module attributes {stable_mosaic.version = 11 : i64} {
  func.func @kernel(%arg0: i32, %arg1: memref<1x4x256xf32, #tpu.memory_space<vmem>>, %arg2: memref<8x36xf32, #tpu.memory_space<vmem>>, %arg3: memref<2x256xf32, #tpu.memory_space<vmem>>, %arg4: memref<1x8x256xf32, #tpu.memory_space<vmem>>, %arg5: memref<4x290xf32, #tpu.memory_space<vmem>>, %arg6: memref<36x256xf32, #tpu.memory_space<vmem>>) attributes {dimension_semantics = [#tpu.dimension_semantics<parallel>], iteration_bounds = array<i64: 2>, scalar_prefetch = 0 : i64, scratch_operands = 2 : i64, tpu.core_type = #tpu.core_type<tc>, window_params = [{transform_indices = @transform_0, window_bounds = array<i64: 1, 4, 256>}, {pipeline_mode = #tpu.pipeline_mode<synchronous>, transform_indices = @transform_1, window_bounds = array<i64: 8, 36>}, {pipeline_mode = #tpu.pipeline_mode<synchronous>, transform_indices = @transform_2, window_bounds = array<i64: 2, 256>}, {transform_indices = @transform_3, window_bounds = array<i64: 1, 8, 256>}]} {
    %cst = arith.constant 0.000000e+00 : f32
    %0 = vector.broadcast %cst : f32 to vector<4x290xf32>
    %c0 = arith.constant 0 : index
    %c0_0 = arith.constant 0 : index
    %1 = vector.load %arg5[%c0, %c0_0] : memref<4x290xf32, #tpu.memory_space<vmem>>, vector<4x290xf32>
    tpu.vector_store %arg5[%c0, %c0_0], %0 {strides = array<i32>} : memref<4x290xf32, #tpu.memory_space<vmem>>, vector<4x290xf32>,
    %c0_1 = arith.constant 0 : index
    %c0_2 = arith.constant 0 : index
    %c0_3 = arith.constant 0 : index
    %2 = vector.load %arg1[%c0_1, %c0_2, %c0_3] : memref<1x4x256xf32, #tpu.memory_space<vmem>>, vector<1x4x256xf32>
    %3 = vector.shape_cast %2 : vector<1x4x256xf32> to vector<4x256xf32>
    %c0_4 = arith.constant 0 : index
    %c17 = arith.constant 17 : index
    %4 = vector.load %arg5[%c0_4, %c17] : memref<4x290xf32, #tpu.memory_space<vmem>>, vector<4x256xf32>
    tpu.vector_store %arg5[%c0_4, %c17], %3 {strides = array<i32>} : memref<4x290xf32, #tpu.memory_space<vmem>>, vector<4x256xf32>,
    %c0_5 = arith.constant 0 : index
    %c0_6 = arith.constant 0 : index
    %5 = vector.load %arg3[%c0_5, %c0_6] : memref<2x256xf32, #tpu.memory_space<vmem>>, vector<1x256xf32>
    %c1 = arith.constant 1 : index
    %c0_7 = arith.constant 0 : index
    %6 = vector.load %arg3[%c1, %c0_7] : memref<2x256xf32, #tpu.memory_space<vmem>>, vector<1x256xf32>
    %c0_8 = arith.constant 0 : index
    %c0_9 = arith.constant 0 : index
    %7 = vector.load %arg5[%c0_8, %c0_9] : memref<4x290xf32, #tpu.memory_space<vmem>>, vector<4x256xf32>
    %8 = vector.broadcast %5 : vector<1x256xf32> to vector<4x256xf32>
    %9 = arith.mulf %7, %8 : vector<4x256xf32>
    %c0_10 = arith.constant 0 : index
    %c0_11 = arith.constant 0 : index
    %10 = vector.load %arg6[%c0_10, %c0_11] : memref<36x256xf32, #tpu.memory_space<vmem>>, vector<4x256xf32>
    tpu.vector_store %arg6[%c0_10, %c0_11], %9 {strides = array<i32>} : memref<36x256xf32, #tpu.memory_space<vmem>>, vector<4x256xf32>,
    %c0_12 = arith.constant 0 : index
    %c1_13 = arith.constant 1 : index
    %11 = vector.load %arg5[%c0_12, %c1_13] : memref<4x290xf32, #tpu.memory_space<vmem>>, vector<4x256xf32>
    %c4 = arith.constant 4 : index
    %c0_14 = arith.constant 0 : index
    %12 = vector.load %arg6[%c4, %c0_14] : memref<36x256xf32, #tpu.memory_space<vmem>>, vector<4x256xf32>
    tpu.vector_store %arg6[%c4, %c0_14], %11 {strides = array<i32>} : memref<36x256xf32, #tpu.memory_space<vmem>>, vector<4x256xf32>,
    %c0_15 = arith.constant 0 : index
    %c2 = arith.constant 2 : index
    %13 = vector.load %arg5[%c0_15, %c2] : memref<4x290xf32, #tpu.memory_space<vmem>>, vector<4x256xf32>
    %14 = vector.broadcast %6 : vector<1x256xf32> to vector<4x256xf32>
    %15 = arith.mulf %13, %14 : vector<4x256xf32>
    %c8 = arith.constant 8 : index
    %c0_16 = arith.constant 0 : index
    %16 = vector.load %arg6[%c8, %c0_16] : memref<36x256xf32, #tpu.memory_space<vmem>>, vector<4x256xf32>
    tpu.vector_store %arg6[%c8, %c0_16], %15 {strides = array<i32>} : memref<36x256xf32, #tpu.memory_space<vmem>>, vector<4x256xf32>,
    %c0_17 = arith.constant 0 : index
    %c16 = arith.constant 16 : index
    %17 = vector.load %arg5[%c0_17, %c16] : memref<4x290xf32, #tpu.memory_space<vmem>>, vector<4x256xf32>
    %18 = vector.broadcast %5 : vector<1x256xf32> to vector<4x256xf32>
    %19 = arith.mulf %17, %18 : vector<4x256xf32>
    %c12 = arith.constant 12 : index
    %c0_18 = arith.constant 0 : index
    %20 = vector.load %arg6[%c12, %c0_18] : memref<36x256xf32, #tpu.memory_space<vmem>>, vector<4x256xf32>
    tpu.vector_store %arg6[%c12, %c0_18], %19 {strides = array<i32>} : memref<36x256xf32, #tpu.memory_space<vmem>>, vector<4x256xf32>,
    %c0_19 = arith.constant 0 : index
    %c17_20 = arith.constant 17 : index
    %21 = vector.load %arg5[%c0_19, %c17_20] : memref<4x290xf32, #tpu.memory_space<vmem>>, vector<4x256xf32>
    %c16_21 = arith.constant 16 : index
    %c0_22 = arith.constant 0 : index
    %22 = vector.load %arg6[%c16_21, %c0_22] : memref<36x256xf32, #tpu.memory_space<vmem>>, vector<4x256xf32>
    tpu.vector_store %arg6[%c16_21, %c0_22], %21 {strides = array<i32>} : memref<36x256xf32, #tpu.memory_space<vmem>>, vector<4x256xf32>,
    %c0_23 = arith.constant 0 : index
    %c18 = arith.constant 18 : index
    %23 = vector.load %arg5[%c0_23, %c18] : memref<4x290xf32, #tpu.memory_space<vmem>>, vector<4x256xf32>
    %24 = vector.broadcast %6 : vector<1x256xf32> to vector<4x256xf32>
    %25 = arith.mulf %23, %24 : vector<4x256xf32>
    %c20 = arith.constant 20 : index
    %c0_24 = arith.constant 0 : index
    %26 = vector.load %arg6[%c20, %c0_24] : memref<36x256xf32, #tpu.memory_space<vmem>>, vector<4x256xf32>
    tpu.vector_store %arg6[%c20, %c0_24], %25 {strides = array<i32>} : memref<36x256xf32, #tpu.memory_space<vmem>>, vector<4x256xf32>,
    %c0_25 = arith.constant 0 : index
    %c32 = arith.constant 32 : index
    %27 = vector.load %arg5[%c0_25, %c32] : memref<4x290xf32, #tpu.memory_space<vmem>>, vector<4x256xf32>
    %28 = vector.broadcast %5 : vector<1x256xf32> to vector<4x256xf32>
    %29 = arith.mulf %27, %28 : vector<4x256xf32>
    %c24 = arith.constant 24 : index
    %c0_26 = arith.constant 0 : index
    %30 = vector.load %arg6[%c24, %c0_26] : memref<36x256xf32, #tpu.memory_space<vmem>>, vector<4x256xf32>
    tpu.vector_store %arg6[%c24, %c0_26], %29 {strides = array<i32>} : memref<36x256xf32, #tpu.memory_space<vmem>>, vector<4x256xf32>,
    %c0_27 = arith.constant 0 : index
    %c33 = arith.constant 33 : index
    %31 = vector.load %arg5[%c0_27, %c33] : memref<4x290xf32, #tpu.memory_space<vmem>>, vector<4x256xf32>
    %c28 = arith.constant 28 : index
    %c0_28 = arith.constant 0 : index
    %32 = vector.load %arg6[%c28, %c0_28] : memref<36x256xf32, #tpu.memory_space<vmem>>, vector<4x256xf32>
    tpu.vector_store %arg6[%c28, %c0_28], %31 {strides = array<i32>} : memref<36x256xf32, #tpu.memory_space<vmem>>, vector<4x256xf32>,
    %c0_29 = arith.constant 0 : index
    %c34 = arith.constant 34 : index
    %33 = vector.load %arg5[%c0_29, %c34] : memref<4x290xf32, #tpu.memory_space<vmem>>, vector<4x256xf32>
    %34 = vector.broadcast %6 : vector<1x256xf32> to vector<4x256xf32>
    %35 = arith.mulf %33, %34 : vector<4x256xf32>
    %c32_30 = arith.constant 32 : index
    %c0_31 = arith.constant 0 : index
    %36 = vector.load %arg6[%c32_30, %c0_31] : memref<36x256xf32, #tpu.memory_space<vmem>>, vector<4x256xf32>
    tpu.vector_store %arg6[%c32_30, %c0_31], %35 {strides = array<i32>} : memref<36x256xf32, #tpu.memory_space<vmem>>, vector<4x256xf32>,
    %c0_32 = arith.constant 0 : index
    %c0_33 = arith.constant 0 : index
    %37 = vector.load %arg6[%c0_32, %c0_33] : memref<36x256xf32, #tpu.memory_space<vmem>>, vector<36x256xf32>
    %c0_34 = arith.constant 0 : index
    %c0_35 = arith.constant 0 : index
    %38 = vector.load %arg2[%c0_34, %c0_35] : memref<8x36xf32, #tpu.memory_space<vmem>>, vector<8x36xf32>
    %cst_36 = arith.constant dense<0.000000e+00> : vector<8x256xf32>
    %39 = tpu.matmul %38, %37, %cst_36 {dimension_numbers = #tpu.dot_dimension_numbers<[1], [0], [0], [1], [0, 0, 1, 1], [], []>} : vector<8x36xf32>, vector<36x256xf32>, vector<8x256xf32> -> vector<8x256xf32>
    %cst_37 = arith.constant 0.000000e+00 : f32
    %40 = vector.broadcast %cst_37 : f32 to vector<8x256xf32>
    %41 = arith.maximumf %39, %40 : vector<8x256xf32>
    %c0_38 = arith.constant 0 : index
    %c0_39 = arith.constant 0 : index
    %c0_40 = arith.constant 0 : index
    %42 = vector.load %arg4[%c0_38, %c0_39, %c0_40] : memref<1x8x256xf32, #tpu.memory_space<vmem>>, vector<1x8x256xf32>
    %43 = vector.shape_cast %42 : vector<1x8x256xf32> to vector<8x256xf32>
    %44 = vector.shape_cast %41 : vector<8x256xf32> to vector<1x8x256xf32>
    tpu.vector_store %arg4[%c0_38, %c0_39, %c0_40], %44 {strides = array<i32>} : memref<1x8x256xf32, #tpu.memory_space<vmem>>, vector<1x8x256xf32>,
    return
  }
  func.func @transform_0(%arg0: i32) -> (i32, i32, i32) {
    %c0_i32 = arith.constant 0 : i32
    %c0_i32_0 = arith.constant 0 : i32
    %c0_i32_1 = arith.constant 0 : i32
    return %arg0, %c0_i32, %c0_i32_0 : i32, i32, i32
  }
  func.func @transform_1(%arg0: i32) -> (i32, i32) {
    %c0_i32 = arith.constant 0 : i32
    %c0_i32_0 = arith.constant 0 : i32
    %c0_i32_1 = arith.constant 0 : i32
    return %c0_i32, %c0_i32_0 : i32, i32
  }
  func.func @transform_2(%arg0: i32) -> (i32, i32) {
    %c0_i32 = arith.constant 0 : i32
    %c0_i32_0 = arith.constant 0 : i32
    %c0_i32_1 = arith.constant 0 : i32
    return %c0_i32, %c0_i32_0 : i32, i32
  }
  func.func @transform_3(%arg0: i32) -> (i32, i32, i32) {
    %c0_i32 = arith.constant 0 : i32
    %c0_i32_0 = arith.constant 0 : i32
    %c0_i32_1 = arith.constant 0 : i32
    return %arg0, %c0_i32, %c0_i32_0 : i32, i32, i32
  }
}

</mosaic_0001>

<bundles_post_ra>
// kernel: tpu_custom_call.1
= control target key start
LH: loop header
LB: loop body
LE: loop exit
PB: predicated region body
PF: predicated region fallthrough
CT: control target
= control target key end

     0   :  { %8 = vsyncpa [#allocation5], 0  ;;  %s1156_s0 = inlined_call_operand.hbm [shape: f32[2,4,256], index: 0, kind: input, shape index: {}]   ;;  %s1157_s1 = inlined_call_operand.hbm [shape: f32[8,36], index: 1, kind: input, shape index: {}]   ;;  %s1158_s2 = inlined_call_operand.hbm [shape: f32[2,256], index: 2, kind: input, shape index: {}]   ;;  %s1159_s3 = inlined_call_operand.hbm [shape: f32[2,8,256], index: 3, kind: output, shape index: {}]  }
   0x1   :  { %10 = vsyncpa [#allocation5 + $0x1], 0 }
   0x2   :  { %11 = vsyncpa [#allocation8], 0 }
   0x3   :  { %12 = vsyncpa [#allocation6], 0 }
   0x4   :  { %14 = vsyncpa [#allocation6 + $0x1], 0  ;;  %s953_s12 = smov 0   ;;  %s955_s13 = smov 0  }
   0x5   :  { %s957_s14 = smov 0   ;;  %s959_s15 = smov 0  }
   0x6 LB: > { %s974_s16 = sadd.s32 4294967295, %s912_s15   ;;  %s655_s17 = sadd.s32 4294967294, %s912_s15   ;;  %s912_s15 = sphi %s959_s15, %s1181_s15   ;;  %s908_s14 = sphi %s957_s14, %s1180_s14   ;;  %s904_s13 = sphi %s955_s13, %s1179_s13   ;;  %s900_s12 = sphi %s953_s12, %s1178_s12  }
   0x7   : > { %p40_p0 = scmp.ne.s32.totalorder %s904_s13, %s900_s12  ;;  %p1160_p1 = scmp.eq.s32.totalorder %s974_s16, 0 }
   0x8   : > { %p112_p3 = scmp.eq.s32.totalorder %s655_s17, 1  ;;  %p656_p5 = scmp.ge.s32.totalorder %s912_s15, 1 }
   0x9   : > { %p983_p4 = por %p1160_p1, %p40_p0  ;;  %p119_p7 = scmp.lt.s32.totalorder %s912_s15, 3 }
   0xa   : > { %p988_p6 = por %p112_p3, %p40_p0  ;;  %s914_s21 = smov [#allocation7]  }
   0xb   : > { %s1164_s18 = scalar_select %p983_p4, 1, 0 }
   0xc   : > { %s1165_s19 = scalar_select %p988_p6, 1, 0 }
   0xd   : > { %p993_p8 = pnand %p656_p5, %p119_p7  ;;  %s132_s22 = sshll.u32 %s914_s21, 4  ;;  %s133_s22 = int_to_ptr.vmem [resolvable:$true] %s132_s22 }
   0xe   : > { %s915_s23 = smov [#allocation9]   ;;  %s1007_s26 = sadd.s32 1, %s912_s15  }
   0xf   : > { %s1166_s20 = scalar_select %p993_p8, 1, 0 }
  0x10   : > { %p690_p10 = pneg %p993_p8  ;;  %s143_s24 = sshll.u32 %s915_s23, 4  ;;  %s144_s24 = int_to_ptr.vmem [resolvable:$true] %s143_s24 }
  0x11   : > { %s24_s27 = ssub.s32 %s912_s15, %s1007_s26  ;;  %s775_s28 = scalar_lea.vmem %s133_s22, 128 }
  0x12   : > { %p1002_p11 = pnand %p690_p10, %p1160_p1  ;;  %p776_p13 = scmp.ne.s32.totalorder %s133_s22, %s775_s28 }
  0x13   : > { %p783_p5 = scmp.lt.s32.totalorder %s133_s22, %s133_s22  ;;  %p784_p7 = scmp.lt.s32.totalorder %s775_s28, %s775_s28 }
  0x14   : > { %p766_p12 = pneg %p1002_p11 }
  0x15   : > { %p785_p10 = por %p784_p7, %p783_p5 }
  0x16   : > { %p778_p0 = pnand %p776_p13, %p766_p12 }
  0x18   : > { %p779_p3 = pneg %p778_p0 }
  0x1a   : > { %p786_p9 = pnand %p785_p10, %p779_p3 }
  0x1c   : > { %789 = shalt.err (!%p786_p9)
}
  0x1d   : > { %693 = dma.hbm_to_vmem [thread:$0]  (!%p1002_p11), %s1157_s1, 128, %s133_s22, [#allocation8]  }
  0x1e   : > { %s801_s4 = scalar_lea.vmem %s144_s24, 64  ;;  %p809_p13 = scmp.lt.s32.totalorder %s144_s24, %s144_s24 }
  0x1f   : > { %p802_p1 = scmp.ne.s32.totalorder %s144_s24, %s801_s4  ;;  %p810_p0 = scmp.lt.s32.totalorder %s801_s4, %s801_s4 }
  0x21   : > { %p804_p2 = pnand %p802_p1, %p766_p12  ;;  %p811_p4 = por %p810_p0, %p809_p13 }
  0x23   : > { %p805_p6 = pneg %p804_p2 }
  0x25   : > { %p812_p8 = pnand %p811_p4, %p805_p6 }
  0x27   : > { %815 = shalt.err (!%p812_p8)
}
  0x28   : > { %696 = dma.hbm_to_vmem [thread:$0]  (!%p1002_p11), %s1158_s2, 64, %s144_s24, [#allocation8]  }
  0x29   : > { %p25_p1 = scmp.eq.s32.totalorder %s24_s27, 0  ;;  %s27_s7 = sadd.s32 1, %s908_s14 }
  0x2a   : > { %p34_p2 = scmp.ne.s32.totalorder %s908_s14, %s904_s13  ;;  %p35_p4 = scmp.eq.s32.totalorder %s912_s15, 0 }
  0x2b   : > { %s1034_s8 = scalar_select %p25_p1, %s908_s14, %s27_s7  }
  0x2c   : > { %p36_p6 = por %p35_p4, %p34_p2  ;;  %p1168_p8 = scmp.eq.s32.totalorder %s974_s16, 1 }
  0x2d   : > { %p707_p12 = scmp.lt.s32.totalorder %s912_s15, 2  ;;  %s154_s10 = sand.u32 1, %s908_s14  }
  0x2e   : > { %p1038_p9 = por %p1168_p8, %p34_p2  ;;  %s660_s11 = sshll.u32 %s154_s10, 3 }
  0x2f   : > { %s676_s17 = sshll.u32 %s912_s15, 7  ;;  %s158_s24 = scalar_lea.vmem [#allocation4], %s660_s11 }
  0x30   : > { %s1169_s9 = scalar_select %p1038_p9, 1, 0 }
  0x31   : > { %s1048_s23 = scalar_lea.hbm %s1156_s0, %s676_s17  ;;  %s166_s25 = sshll.u32 %s158_s24, 4  ;;  %s167_s25 = int_to_ptr.vmem [resolvable:$true] %s166_s25 }
  0x32   : > { %p1050_p11 = pnand %p707_p12, %p36_p6  ;;  %s155_s28 = scalar_lea.sflag [#allocation5], %s154_s10 }
  0x33   : > { %s816_s29 = scalar_lea.hbm %s1048_s23, 128  ;;  %s821_s5 = scalar_lea.hbm %s1156_s0, 256 }
  0x34   : > { %p817_p3 = scmp.ne.s32.totalorder %s1048_s23, %s816_s29  ;;  %p818_p5 = pneg %p1050_p11 }
  0x35   : > { %p822_p13 = scmp.lt.s32.totalorder %s1048_s23, %s1156_s0  ;;  %p823_p0 = scmp.lt.s32.totalorder %s821_s5, %s816_s29 }
  0x36   : > { %p819_p7 = pnand %p818_p5, %p817_p3 }
  0x37   : > { %p824_p1 = por %p823_p0, %p822_p13 }
  0x38   : > { %p820_p10 = pneg %p819_p7 }
  0x3a   : > { %p825_p2 = pnand %p824_p1, %p820_p10 }
  0x3c   : > { %828 = shalt.err (!%p825_p2)
}
  0x3d   : > { %s829_s11 = scalar_lea.vmem %s167_s25, 128  ;;  %s916_s10 = smov [#allocation4]  }
  0x3e   : > { %p830_p4 = scmp.ne.s32.totalorder %s167_s25, %s829_s11  ;;  %s834_s17 = sshll.u32 %s916_s10, 4  ;;  %s835_s17 = int_to_ptr.vmem [resolvable:$false] %s834_s17 }
  0x3f   : > { %s836_s21 = scalar_lea.vmem %s835_s17, 256  ;;  %p837_p12 = scmp.lt.s32.totalorder %s167_s25, %s835_s17 }
  0x40   : > { %p832_p6 = pnand %p830_p4, %p818_p5  ;;  %p838_p3 = scmp.lt.s32.totalorder %s836_s21, %s829_s11 }
  0x42   : > { %p833_p8 = pneg %p832_p6  ;;  %p839_p7 = por %p838_p3, %p837_p12 }
  0x44   : > { %p840_p9 = pnand %p839_p7, %p833_p8 }
  0x46   : > { %843 = shalt.err (!%p840_p9)
}
  0x47   : > { %700 = dma.hbm_to_vmem [thread:$0]  (!%p1050_p11), %s1048_s23, 128, %s167_s25, %s155_s28  }
  0x48   : > { %p1171_p10 = scmp.ne.s32.totalorder %s1166_s20, 0 }
  0x49   : > { %s1071_s22 = sand.u32 (!%p1171_p10), 1, %s904_s13   ;;  %p1172_p5 = scmp.ne.s32.totalorder (!%p1171_p10), %s1164_s18, 0 }
  0x4a   : > { %175 = sbr.rel (%p1171_p10) target bundleno = 591 (0x24f), region = 32  ;;  %s664_s24 = sshll.u32 (!%p1171_p10), %s1071_s22, 3 }
  0x4b   : > { %s178_s29 = scalar_lea.sflag (!%p1171_p10), [#allocation5], %s1071_s22  ;;  %s181_s30 = scalar_lea.vmem (!%p1171_p10), [#allocation4], %s664_s24 }
  0x4f   : > { %887 = dma.done.wait (%p1172_p5), %s178_s29, 128  }
  0x50   : > { %889 = vsyncadd (%p1172_p5), %s178_s29, 4294967168  ;;  %p1173_p9 = scmp.eq.s32.totalorder %s974_s16, 0 }
  0x52   : > { %891 = dma.done.wait (%p1173_p9), [#allocation8], 192   ;;  %p1174_p11 = pmov %p1173_p9 }
  0x53   : > { %v235_v0 = vlaneseq  ;;  %vm213_vm0 = vcmask 273408   ;;  %v917_v1 = vmov 0.0   ;;  %v215_v5 = vld [vmem:[%s181_s30] sm:$0xff]  ;;  %v230_v6 = vld [vmem:[#allocation9] ss:$2 sm:$0x3] }
  0x54   : > { %893 = vsyncadd (%p1174_p11), [#allocation8], 4294967104  ;;  %212 = vst [vmem:[#allocation2] sm:$0xff] %v917_v1  ;;  %540 = vmatprep.mubr.f32.mxu0 %v917_v1  ;;  %s918_s20 = smov 17   ;;  %s919_s18 = smov 32   ;;  %vm224_vm1 = vcmask 1043592  }
  0x55   : > { %214 = vst.msk [vmem:[#allocation2 + $0x8] sm:$0xf] %vm213_vm0, %v917_v1  ;;  %v236_v2 = vshrl.u32 %v235_v0, 7  ;;  %217 = vrot.lane.b32.xlu0 %v215_v5, %s918_s20  ;;  %v232_v9 = vld [vmem:[#allocation9 + $0x1] ss:$2 sm:$0x3] }
  0x56   : > { %s920_s23 = smov 34   ;;  %s921_s25 = smov 18   ;;  %vm225_vm2 = vcmask 1047556   ;;  %vm220_vm3 = vcmask 138240   ;;  %vm228_vm4 = vcmask 134144   ;;  %vm386_vm6 = vcmask 261120  }
  0x57   : > { %v237_v3 = vsub.s32 0, %v236_v2  ;;  %v241_v4 = vsub.s32 1, %v236_v2  ;;  %s922_s27 = smov 2   ;;  %s923_s28 = smov 16   ;;  %vm226_vm5 = vmor %vm225_vm2, %vm224_vm1  ;;  %vm432_vm7 = vcmask 277504   ;;  %vm358_vm8 = vcmask 146432  }
  0x58   : > { %s924_s4 = smov 111   ;;  %s925_s5 = smov 95   ;;  %vm312_vm9 = vcmask 130048   ;;  %vm285_vm10 = vcmask 15360   ;;  %vm420_vm11 = vcmask 777216   ;;  %vm346_vm12 = vcmask 908288  }
  0x59   : > { %v238_v7 = vrot.slane %v230_v6, %v237_v3  ;;  %v242_v8 = vrot.slane %v230_v6, %v241_v4  ;;  %v276_v10 = vrot.slane %v232_v9, %v237_v3  ;;  %v280_v11 = vrot.slane %v232_v9, %v241_v4  ;;  %s926_s6 = smov 96   ;;  %s927_s7 = smov 127  }
  0x5a   : > { %s928_s11 = smov 126   ;;  %s929_s10 = smov 94   ;;  %vm374_vm13 = vcmask 900096   ;;  %vm328_vm14 = vcmask 916480   ;;  %vm447_vm15 = vcmask 769024   ;;  %vm401_vm0 = vcmask 785408  }
  0x5b   : > { %v243_v12 = vcombine.low %v238_v7, %v242_v8  ;;  %v281_v13 = vcombine.low %v276_v10, %v280_v11  ;;  %s930_s17 = smov 110   ;;  %s931_s21 = smov 112   ;;  %vm300_vm1 = vcmask 1031168   ;;  %vm469_vm2 = vcmask 1043456  }
  0x5c   : > { %s667_s24 = sshll.u32 %s1071_s22, 4  ;;  %s677_s29 = sshll.u32 %s974_s16, 8 }
  0x5d   : > { %383 = vrot.lane.b32.xlu1 %v243_v12, %s919_s18  ;;  %429 = vrot.lane.b32.xlu0 %v281_v13, %s920_s23  ;;  %s211_s30 = scalar_lea.vmem [#allocation10], %s667_s24  ;;  %p1175_p0 = scmp.ne.s32.totalorder %s1169_s9, 0 }
  0x5e   : > { %s566_s20 = sshll.u32 %s211_s30, 4  ;;  %s567_s20 = int_to_ptr.vmem [resolvable:$true] %s566_s20 }
  0x61   : > { %355 = vrot.lane.b32.xlu1 %v281_v13, %s921_s25  ;;  %282 = vrot.lane.b32.xlu0 %v281_v13, %s922_s27  ;;  %s564_s25 = scalar_lea.hbm %s1159_s3, %s677_s29  ;;  %s552_s27 = scalar_lea.sflag [#allocation6], %s1071_s22 }
  0x65   : > { %309 = vrot.lane.b32.xlu1 %v243_v12, %s923_s28  ;;  %s844_s28 = scalar_lea.vmem %s567_s20, 256 }
  0x66   : > { %p845_p13 = scmp.ne.s32.totalorder %s567_s20, %s844_s28 }
  0x68   : > { %p846_p1 = pnand %p845_p13, %p1175_p0 }
  0x6a   : > { %p847_p2 = pneg %p846_p1 }
  0xc7   : > { %v218_v14 = vpop.permute.xlu0 %217 }
  0xc8   : > { %v219_v15 = vrot.slane %v218_v14, 4 }
  0xca   : > { %v221_v16 = vsel %vm220_vm3, %v219_v15, %v218_v14  ;;  %229 = vst.msk [vmem:[#allocation2 + $0x8] sm:$0xf] %vm228_vm4, %v219_v15  ;;  %vm263_vm3 = vcmask 1039360   ;;  %vm465_vm4 = vcmask 293888  }
  0xcb   : > { %227 = vst.msk [vmem:[#allocation2] sm:$0xff] %vm226_vm5, %v221_v16 }
  0xcf   : > { %v384_v17 = vpop.permute.xlu1 %383  ;;  %v430_v18 = vpop.permute.xlu0 %429 }
  0xd0   : > { %v385_v19 = vrot.slane %v384_v17, 4  ;;  %v431_v26 = vrot.slane %v430_v18, 4 }
  0xd1   : > { %v382_v21 = vld [vmem:[#allocation2 + $0x8] sm:$0xf] }
  0xd2   : > { %v1083_v20 = vld [vmem:[#allocation2] sm:$0xff]  ;;  %v336_v22 = vld [vmem:[#allocation2 + $0x8] sm:$0xf]  ;;  %v391_v23 = vmul.f32 %v385_v19, %v382_v21  ;;  %v387_v35 = vsel %vm386_vm6, %v385_v19, %v384_v17  ;;  %v433_v36 = vsel %vm432_vm7, %v431_v26, %v430_v18 }
  0xd3   : > { %344 = vrot.lane.b32.xlu0 %v336_v22, %s924_s4  ;;  %416 = vrot.lane.b32.xlu1 %v1083_v20, %s925_s5  ;;  %v283_v24 = vpop.permute.xlu0 %282  ;;  %v245_v25 = vmul.f32 %v243_v12, %v1083_v20  ;;  %v762_v28 = vld [vmem:[#allocation2 + $0x8] ss:$0 sps:$4 sm:$0xff]   ;;  %v356_v32 = vpop.permute.xlu1 %355  ;;  %v390_v37 = vmul.f32 %v387_v35, %v1083_v20  ;;  %v436_v38 = vmul.f32 %v433_v36, %v1083_v20 }
  0xd4   : > { %v284_v27 = vrot.slane %v283_v24, 4  ;;  %v428_v30 = vld [vmem:[#allocation2 + $0x8] sm:$0xf]  ;;  %v357_v39 = vrot.slane %v356_v32, 4  ;;  %v412_v44 = vcombine.low %v1083_v20, %v1083_v20  ;;  %v339_v45 = vcombine.high %v1083_v20, %v1083_v20 }
  0xd5   : > { %v247_v29 = vcombine.high %v245_v25, %v245_v25  ;;  %249 = vst [vmem:[#allocation3 + $0x30] sm:$0xf] %v245_v25  ;;  %v271_v31 = vld [vmem:[#allocation2 + $0x8] sm:$0xf]  ;;  %v437_v33 = vmul.f32 %v431_v26, %v428_v30  ;;  %v440_v56 = vcombine.high %v436_v38, %v436_v38  ;;  %v394_v58 = vcombine.high %v390_v37, %v390_v37 }
  0xd6   : > { %v290_v34 = vmul.f32 %v284_v27, %v271_v31  ;;  %v354_v40 = vld [vmem:[#allocation2 + $0x8] sm:$0xf]  ;;  %v359_v46 = vsel %vm358_vm8, %v357_v39, %v356_v32  ;;  %v286_v54 = vsel %vm285_vm10, %v284_v27, %v283_v24 }
  0xd7   : > { %399 = vrot.lane.b32.xlu0 %v391_v23, %s926_s6  ;;  %340 = vrot.lane.b32.xlu1 %v1083_v20, %s924_s4  ;;  %250 = vst [vmem:[#allocation3] sm:$0xf] %v247_v29  ;;  %v310_v41 = vpop.permute.xlu1 %309  ;;  %v363_v42 = vmul.f32 %v357_v39, %v354_v40  ;;  %v308_v47 = vld [vmem:[#allocation2 + $0x8] sm:$0xf]  ;;  %v362_v48 = vmul.f32 %v359_v46, %v1083_v20 }
  0xd8   : > { %v311_v43 = vrot.slane %v310_v41, 4  ;;  %v289_v55 = vmul.f32 %v286_v54, %v1083_v20  ;;  %v763_v61 = vld [vmem:[#allocation2 + $0x8] ss:$0 sps:$4 sm:$0xff]  }
  0xd9   : > { %v367_v50 = vcombine.low %v363_v42, %v363_v42  ;;  %v366_v57 = vcombine.low %v362_v48, %v362_v48 }
  0xda   : > { %v317_v49 = vmul.f32 %v311_v43, %v308_v47  ;;  %v313_v51 = vsel %vm312_vm9, %v311_v43, %v310_v41  ;;  %v293_v60 = vcombine.high %v289_v55, %v289_v55 }
  0xdb   : > { %418 = vrot.lane.b32.xlu0 %v762_v28, %s925_s5  ;;  %259 = vrot.lane.b32.xlu1 %v1083_v20, %s927_s7  ;;  %v316_v52 = vmul.f32 %v313_v51, %v1083_v20 }
  0xdc   : > { %v321_v53 = vcombine.low %v317_v49, %v317_v49 }
  0xdd   : > { %v320_v59 = vcombine.low %v316_v52, %v316_v52 }
  0xdf   : > { %298 = vrot.lane.b32.xlu0 %v290_v34, %s928_s11  ;;  %445 = vrot.lane.b32.xlu1 %v437_v33, %s929_s10 }
  0xe3   : > { %441 = vrot.lane.b32.xlu0 %v436_v38, %s929_s10  ;;  %395 = vrot.lane.b32.xlu1 %v390_v37, %s926_s6 }
  0xe7   : > { %414 = vrot.lane.b32.xlu0 %v412_v44, %s925_s5  ;;  %342 = vrot.lane.b32.xlu1 %v339_v45, %s924_s4  ;;  %s932_s4 = smov [#allocation10]  }
  0xe8   : > { %s848_s16 = sshll.u32 %s932_s4, 4  ;;  %s849_s16 = int_to_ptr.vmem [resolvable:$false] %s848_s16 }
  0xe9   : > { %s850_s5 = scalar_lea.vmem %s849_s16, 512  ;;  %p851_p4 = scmp.lt.s32.totalorder %s567_s20, %s849_s16 }
  0xea   : > { %p852_p6 = scmp.lt.s32.totalorder %s850_s5, %s844_s28 }
  0xeb   : > { %372 = vrot.lane.b32.xlu0 %v367_v50, %s930_s17  ;;  %370 = vrot.lane.b32.xlu1 %v362_v48, %s930_s17  ;;  %v464_v48 = vld [vmem:[#allocation7] sm:$0xff] }
  0xec   : > { %p853_p8 = por %p852_p6, %p851_p4 }
  0xee   : > { %p854_p12 = pnand %p853_p8, %p847_p2 }
  0xef   : > { %326 = vrot.lane.b32.xlu0 %v321_v53, %s931_s21  ;;  %324 = vrot.lane.b32.xlu1 %v316_v52, %s931_s21 }
  0xf3   : > { %443 = vrot.lane.b32.xlu0 %v440_v56, %s929_s10  ;;  %294 = vrot.lane.b32.xlu1 %v289_v55, %s928_s11 }
  0xf7   : > { %368 = vrot.lane.b32.xlu0 %v366_v57, %s930_s17  ;;  %397 = vrot.lane.b32.xlu1 %v394_v58, %s926_s6 }
  0xfb   : > { %322 = vrot.lane.b32.xlu0 %v320_v59, %s931_s21  ;;  %296 = vrot.lane.b32.xlu1 %v293_v60, %s928_s11 }
  0xff   : > { %261 = vrot.lane.b32.xlu0 %v763_v61, %s927_s7  ;;  %257 = vrot.lane.b32.xlu1 %v412_v44, %s927_s7 }
 0x145   : > { %v345_v62 = vpop.permute.xlu0 %344  ;;  %v417_v63 = vpop.permute.xlu1 %416 }
 0x149   : > { %v400_v0 = vpop.permute.xlu0 %399  ;;  %v341_v1 = vpop.permute.xlu1 %340 }
 0x14d   : > { %v419_v2 = vpop.permute.xlu0 %418  ;;  %v260_v3 = vpop.permute.xlu1 %259 }
 0x14e   : > { %v422_v4 = vsel %vm420_vm11, %v417_v63, %v419_v2 }
 0x14f   : > { %426 = vst [vmem:[#allocation3 + $0x20] sm:$0xf0] %v422_v4 }
 0x151   : > { %v299_v5 = vpop.permute.xlu0 %298  ;;  %v446_v6 = vpop.permute.xlu1 %445 }
 0x155   : > { %v442_v7 = vpop.permute.xlu0 %441  ;;  %v396_v8 = vpop.permute.xlu1 %395 }
 0x159   : > { %v415_v9 = vpop.permute.xlu0 %414  ;;  %v343_v10 = vpop.permute.xlu1 %342 }
 0x15a   : > { %v421_v11 = vsel %vm420_vm11, %v415_v9, %v417_v63  ;;  %v347_v12 = vsel %vm346_vm12, %v341_v1, %v343_v10  ;;  %v348_v13 = vsel %vm346_vm12, %v343_v10, %v345_v62 }
 0x15b   : > { %425 = vst [vmem:[#allocation3 + $0x8] sm:$0xf0] %v421_v11  ;;  %351 = vst [vmem:[#allocation3 + $0x48] sm:$0xf] %v347_v12 }
 0x15c   : > { %352 = vst [vmem:[#allocation3 + $0x28] sm:$0xf] %v348_v13 }
 0x15d   : > { %v373_v14 = vpop.permute.xlu0 %372  ;;  %v371_v15 = vpop.permute.xlu1 %370 }
 0x15e   : > { %v376_v16 = vsel %vm374_vm13, %v371_v15, %v373_v14 }
 0x15f   : > { %380 = vst [vmem:[#allocation3 + $0x28] sm:$0xf0] %v376_v16 }
 0x161   : > { %v327_v17 = vpop.permute.xlu0 %326  ;;  %v325_v18 = vpop.permute.xlu1 %324 }
 0x162   : > { %v330_v19 = vsel %vm328_vm14, %v325_v18, %v327_v17 }
 0x163   : > { %334 = vst [vmem:[#allocation3 + $0x10] sm:$0xf0] %v330_v19 }
 0x165   : > { %v444_v20 = vpop.permute.xlu0 %443  ;;  %v295_v21 = vpop.permute.xlu1 %294 }
 0x166   : > { %v448_v22 = vsel %vm447_vm15, %v442_v7, %v444_v20  ;;  %v449_v23 = vsel %vm447_vm15, %v444_v20, %v446_v6  ;;  %v459_v42 = vld [vmem:[#allocation3 + $0x28] sm:$0xff] }
 0x167   : > { %452 = vst [vmem:[#allocation3 + $0x40] sm:$0xf] %v448_v22  ;;  %453 = vst [vmem:[#allocation3 + $0x38] sm:$0xf] %v449_v23 }
 0x169   : > { %v369_v24 = vpop.permute.xlu0 %368  ;;  %v398_v25 = vpop.permute.xlu1 %397 }
 0x16a   : > { %v375_v26 = vsel %vm374_vm13, %v369_v24, %v371_v15  ;;  %v402_v27 = vsel %vm401_vm0, %v396_v8, %v398_v25  ;;  %v403_v28 = vsel %vm401_vm0, %v398_v25, %v400_v0 }
 0x16b   : > { %379 = vst [vmem:[#allocation3 + $0x48] sm:$0xf0] %v375_v26  ;;  %406 = vst [vmem:[#allocation3 + $0x8] sm:$0xf] %v402_v27 }
 0x16c   : > { %407 = vst [vmem:[#allocation3 + $0x20] sm:$0xf] %v403_v28 }
 0x16d   : > { %v323_v29 = vpop.permute.xlu0 %322  ;;  %v297_v30 = vpop.permute.xlu1 %296 }
 0x16e   : > { %v329_v31 = vsel %vm328_vm14, %v323_v29, %v325_v18  ;;  %v301_v32 = vsel %vm300_vm1, %v295_v21, %v297_v30  ;;  %v302_v33 = vsel %vm300_vm1, %v297_v30, %v299_v5  ;;  %v463_v34 = vld [vmem:[#allocation3 + $0x38] sm:$0xf]  ;;  %v462_v35 = vld [vmem:[#allocation3 + $0x40] sm:$0xf] }
 0x16f   : > { %333 = vst [vmem:[#allocation3 + $0x18] sm:$0xf0] %v329_v31  ;;  %305 = vst [vmem:[#allocation3 + $0x18] sm:$0xf] %v301_v32  ;;  %668 = vmatprep.subr.msk.mxu0 %vm469_vm2, %v463_v34 }
 0x170   : > { %306 = vst [vmem:[#allocation3 + $0x10] sm:$0xf] %v302_v33  ;;  %669 = vmatpush1.msk.msra.mxu0 %vm469_vm2, %v462_v35 }
 0x171   : > { %v262_v36 = vpop.permute.xlu0 %261  ;;  %v258_v37 = vpop.permute.xlu1 %257 }
 0x172   : > { %v265_v38 = vsel %vm263_vm3, %v260_v3, %v262_v36  ;;  %v264_v39 = vsel %vm263_vm3, %v258_v37, %v260_v3  ;;  %v460_v41 = vld [vmem:[#allocation3 + $0x8] sm:$0xff] }
 0x173   : > { %v461_v40 = vld [vmem:[#allocation3 + $0x20] sm:$0xff]  ;;  %269 = vst [vmem:[#allocation3] sm:$0xf0] %v265_v38  ;;  %268 = vst [vmem:[#allocation3 + $0x30] sm:$0xf0] %v264_v39  ;;  %v458_v43 = vld [vmem:[#allocation3 + $0x48] sm:$0xff] }
 0x174   : > { %500 = vmatprep.subr.mxu0 %v461_v40 }
 0x175   : > { %501 = vmatpush1.msra.mxu0 %v460_v41 }
 0x176   : > { %502 = vmatprep.subr.mxu0 %v459_v42  ;;  %v456_v45 = vld [vmem:[#allocation3 + $0x18] sm:$0xff] }
 0x177   : > { %503 = vmatpush1.msra.mxu0 %v458_v43  ;;  %v457_v44 = vld [vmem:[#allocation3 + $0x10] sm:$0xff] }
 0x178   : > { %504 = vmatprep.subr.mxu0 %v457_v44 }
 0x179   : > { %505 = vmatpush1.msra.mxu0 %v456_v45 }
 0x17a   : > { %v455_v46 = vld [vmem:[#allocation3] sm:$0xff]  ;;  %v454_v47 = vld [vmem:[#allocation3 + $0x30] sm:$0xff] }
 0x17b   : > { %506 = vmatprep.subr.mxu0 %v455_v46 }
 0x17c   : > { %507 = vmatpush1.msra.mxu0 %v454_v47 }
 0x17d   : > { %670 = vmatmul.mubr.msk.f32.vlgmr.msra.gmra.mxu0 %vm465_vm4, %v464_v48 }
 0x23d   : > { %v542_v49 = vpop.f32.mrf.mxu0 }
 0x23e   : > { %v547_v50 = vmax.f32 %v542_v49, 0.0 }
 0x23f   : > { %v544_v51 = vpop.f32.mrf.mxu0 }
 0x240   : > { %549 = vst [vmem:[%s211_s30] sm:$0xff] %v547_v50  ;;  %v548_v52 = vmax.f32 %v544_v51, 0.0 }
 0x242   : > { %550 = vst [vmem:[%s211_s30 + $0x8] sm:$0xff] %v548_v52 }
 0x243   : > { %857 = shalt.err (!%p854_p12)
}
 0x244   : > { %s858_s6 = scalar_lea.hbm %s564_s25, 256  ;;  %s862_s11 = scalar_lea.hbm %s1159_s3, 512 }
 0x245   : > { %p859_p3 = scmp.ne.s32.totalorder %s564_s25, %s858_s6  ;;  %p863_p5 = scmp.lt.s32.totalorder %s564_s25, %s1159_s3 }
 0x246   : > { %p864_p9 = scmp.lt.s32.totalorder %s862_s11, %s858_s6 }
 0x247   : > { %p860_p7 = pnand %p859_p3, %p1175_p0 }
 0x248   : > { %p865_p11 = por %p864_p9, %p863_p5 }
 0x249   : > { %p861_p10 = pneg %p860_p7 }
 0x24b   : > { %p866_p13 = pnand %p865_p11, %p861_p10 }
 0x24d   : > { %869 = shalt.err (!%p866_p13)
}
 0x24e   : > { %688 = dma.vmem_to_hbm [thread:$0]  (%p1175_p0), %s567_s20, 256, %s564_s25, %s552_s27  }
 0x24f PF: > { %s578_s21 = sand.u32 1, %s900_s12   ;;  %p1176_p1 = scmp.ne.s32.totalorder %s1165_s19, 0 }
 0x250   : > { %p1177_p2 = scmp.ge.s32.totalorder %s912_s15, 2  ;;  %s579_s24 = scalar_lea.sflag [#allocation6], %s578_s21 }
 0x252   : > { %p702_p4 = pnand %p1177_p2, %p1176_p1 }
 0x254   : > { %p703_p6 = pneg %p702_p4 }
 0x256   : > { %895 = dma.done.wait (%p703_p6), %s579_s24, 256  }
 0x257   : > { %897 = vsyncadd (%p703_p6), %s579_s24, 4294967040  ;;  %p17_p8 = scmp.ge.s32.totalorder %s1007_s26, 4   ;;  %s1178_s12 = smov %s904_s13 }
 0x258   : > { %s1179_s13 = smov %s908_s14  ;;  %s1180_s14 = smov %s1034_s8 }
 0x259   : > { %s1181_s15 = smov %s1007_s26  ;;  %19 = sbr.rel (!%p17_p8) target bundleno = 6 (0x6), region = 86 }
 0x25e   :  { %584 = vsyncpa [#allocation5], 1 }
 0x25f   :  { %586 = vsyncpa [#allocation5 + $0x1], 1 }
 0x260   :  { %587 = vsyncpa [#allocation8], 1 }
 0x261   :  { %588 = vsyncpa [#allocation6], 1 }
 0x262   :  { %590 = vsyncpa [#allocation6 + $0x1], 1 }

</bundles_post_ra>
